<compile_context>
chip_gen: v6e
topology: v6e:2x2x1
jax: 0.10.0
libtpu: 0.0.40
codegen_flags: <defaults>
</compile_context>

<pallas_src>
from functools import partial

import jax
import jax.numpy as jnp
from jax.experimental import pallas as pl
from jax.experimental.pallas import tpu as pltpu


def _round_up(x, m):
    return ((x + m - 1) // m) * m


def _sublane_pack(dtype):
    return {4: 8, 2: 16, 1: 32}.get(jnp.dtype(dtype).itemsize, 8)


def _vmem_limit_bytes():
    phys = 128 * 1024 * 1024
    try:
        info = pltpu.get_tpu_info()
        phys = int(getattr(info, "vmem_capacity_bytes", phys) or phys)
    except Exception:
        pass
    # leave headroom: v5e/v6e (128 MiB) -> 96 MiB scoped, v7x (64 MiB) -> 48 MiB scoped
    return max(16 * 1024 * 1024, (phys * 3) // 4)


# --------------------------------------------------------------------------------------
# Fused single-read kernel: whole batch element resident in VMEM.
# --------------------------------------------------------------------------------------
def _sfi_fused_kernel(*refs, height, inv_hw):
    x_refs = refs[:height]
    w1_ref = refs[height]           # (d, C)
    wfc_ref = refs[height + 1]      # (height*C, d)
    prelu_ref = refs[height + 2]    # (1, 1) in SMEM
    o_ref = refs[height + 3]        # (1, C, HW)

    # branch sum + global average pool (f32)
    u = x_refs[0][0].astype(jnp.float32)
    for i in range(1, height):
        u = u + x_refs[i][0].astype(jnp.float32)
    s = jnp.sum(u, axis=1, keepdims=True) * inv_hw                          # (C, 1)

    # conv_du 1x1 (== matmul) + PReLU with scalar slope from SMEM
    z = jnp.dot(w1_ref[...], s, preferred_element_type=jnp.float32)         # (d, 1)
    a = prelu_ref[0, 0]
    z = jnp.where(z >= 0, z, a * z)

    # all `height` 1x1 convs fused into one matmul, softmax over the branch axis
    logits = jnp.dot(wfc_ref[...], z, preferred_element_type=jnp.float32)   # (h*C, 1)
    c = s.shape[0]
    per = [logits[i * c:(i + 1) * c, :] for i in range(height)]
    m = per[0]
    for i in range(1, height):
        m = jnp.maximum(m, per[i])
    exps = [jnp.exp(p - m) for p in per]
    den = exps[0]
    for i in range(1, height):
        den = den + exps[i]
    inv = pl.reciprocal(den, approx=False)   # runs once per batch, perf-irrelevant

    acc = x_refs[0][0].astype(jnp.float32) * (exps[0] * inv)
    for i in range(1, height):
        acc = acc + x_refs[i][0].astype(jnp.float32) * (exps[i] * inv)
    o_ref[0] = acc.astype(o_ref.dtype)


# --------------------------------------------------------------------------------------
# Streaming pass 1: per-channel global-average-pool sums (branches fused elementwise,
# ONE cross-lane reduce per tile). Attention math is hoisted out to XLA.
# --------------------------------------------------------------------------------------
def _sfi_pool_kernel(*refs, height, hw, tile, mask_ragged):
    x_refs = refs[:height]
    s_ref = refs[height]            # (1, c_blk, 1) output block (resident across t)
    acc_ref = refs[height + 1]      # (c_blk, 1) f32 scratch
    t = pl.program_id(2)

    @pl.when(t == 0)
    def _init():
        acc_ref[...] = jnp.zeros_like(acc_ref)

    xs = x_refs[0][0].astype(jnp.float32)
    for i in range(1, height):
        xs = xs + x_refs[i][0].astype(jnp.float32)
    if mask_ragged:  # only emitted when HW % tile != 0: mask garbage lanes of edge block
        col = jax.lax.broadcasted_iota(jnp.int32, xs.shape, 1) + t * tile
        xs = jnp.where(col < hw, xs, 0.0)
    acc_ref[...] += jnp.sum(xs, axis=1, keepdims=True)

    # The output block index is constant over the innermost ("arbitrary") t axis, so the
    # block stays VMEM-resident and is written back once per (b, cb).
    @pl.when(t == pl.num_programs(2) - 1)
    def _finalize():
        s_ref[0] = acc_ref[...]


# --------------------------------------------------------------------------------------
# Streaming pass 2: out = sum_i x_i * att_i  (fully parallel grid).
# --------------------------------------------------------------------------------------
def _sfi_apply_kernel(*refs, height, compute_dtype):
    x_refs = refs[:height]
    att_ref = refs[height]          # (1, height, c_blk, 1)
    o_ref = refs[height + 1]        # (1, c_blk, tile)

    acc = x_refs[0][0].astype(compute_dtype) * att_ref[0, 0].astype(compute_dtype)
    for i in range(1, height):
        acc = acc + x_refs[i][0].astype(compute_dtype) * att_ref[0, i].astype(compute_dtype)
    o_ref[0] = acc.astype(o_ref.dtype)


# --------------------------------------------------------------------------------------
# Wrapper
# --------------------------------------------------------------------------------------
def sfi_forward(inp_feats, w1, prelu_a, wfc, *, mode="auto", tile_cap=None, c_blk_cap=None):
    """inp_feats: list of `height` arrays with shape (B, C, H, W) (NCHW, like PyTorch).

    mode: "auto" (fused single-read path when a batch fits VMEM, else two-pass),
          "fused", or "two_pass". tile_cap / c_blk_cap are test knobs.
    """
    height = len(inp_feats)
    B, C, H, W = inp_feats[0].shape
    HW = H * W
    d = w1.shape[0]
    dtype = inp_feats[0].dtype
    bpe = jnp.dtype(dtype).itemsize

    xs = [x.reshape(B, C, HW) for x in inp_feats]      # free reshapes: no pad, no stack

    vmem_limit = _vmem_limit_bytes()

    # ---------------- fused single-read path ----------------
    hw_lanes = _round_up(HW, 128)
    fused_live = (2 * (height + 1) * C * hw_lanes * bpe     # double-buffered ins + out
                  + 3 * C * hw_lanes * 4                     # in-kernel f32 temporaries
                  + (d * C + height * C * d) * 4)            # weights
    use_fused = (mode == "fused") or (mode == "auto" and fused_live <= int(0.6 * vmem_limit))

    if use_fused:
        w1f = jnp.asarray(w1, jnp.float32)                               # (d, C)
        wfcf = jnp.asarray(wfc, jnp.float32).reshape(height * C, d)      # (h*C, d)
        prelu = jnp.asarray(prelu_a, jnp.float32).reshape(1, 1)
        out = pl.pallas_call(
            partial(_sfi_fused_kernel, height=height, inv_hw=1.0 / float(HW)),
            out_shape=jax.ShapeDtypeStruct((B, C, HW), dtype),
            grid=(B,),
            in_specs=([pl.BlockSpec((1, C, HW), lambda b: (b, 0, 0))
                       for _ in range(height)]
                      + [pl.BlockSpec((d, C), lambda b: (0, 0)),
                         pl.BlockSpec((height * C, d), lambda b: (0, 0)),
                         pl.BlockSpec(memory_space=pltpu.MemorySpace.SMEM)]),
            out_specs=pl.BlockSpec((1, C, HW), lambda b: (b, 0, 0)),
            compiler_params=pltpu.CompilerParams(
                dimension_semantics=("parallel",),
                vmem_limit_bytes=vmem_limit),
        )(*xs, w1f, wfcf, prelu)
        return out.reshape(B, C, H, W)

    # ---------------- two-pass streaming path ----------------
    pack = _sublane_pack(dtype)                 # dtype-aware sublane packing: 8/16/32
    C_pad = _round_up(C, pack)

    # Channel block: largest divisor of C_pad (multiple of pack) that still lets a
    # >=512-lane tile fit the per-block budget (keeps lane-dense stores on every gen).
    per_block_budget = max(128 * pack * bpe,
                           int(0.8 * vmem_limit) // (2 * (height + 1)))
    c_target = max(pack, min(C_pad, (per_block_budget // (512 * bpe)) // pack * pack))
    if c_blk_cap is not None:
        c_target = max(pack, min(c_target, c_blk_cap))
    c_blk = pack
    dsor = pack
    while dsor <= C_pad:
        if C_pad % dsor == 0 and dsor <= c_target:
            c_blk = dsor
        dsor += pack
    CB = C_pad // c_blk

    tile = (per_block_budget // (c_blk * bpe)) // 128 * 128
    tile = max(128, min(tile, _round_up(HW, 128)))
    if tile_cap is not None:
        tile = max(128, min(tile, tile_cap))
    T = pl.cdiv(HW, tile)
    mask_ragged = (HW % tile) != 0

    # pass 1: branch-sum + spatial accumulation (no weights, no attention math inside)
    s_sum = pl.pallas_call(
        partial(_sfi_pool_kernel, height=height, hw=HW, tile=tile,
                mask_ragged=mask_ragged),
        out_shape=jax.ShapeDtypeStruct((B, C_pad, 1), jnp.float32),
        grid=(B, CB, T),
        in_specs=[pl.BlockSpec((1, c_blk, tile), lambda b, cb, t: (b, cb, t))
                  for _ in range(height)],
        out_specs=pl.BlockSpec((1, c_blk, 1), lambda b, cb, t: (b, cb, 0)),
        scratch_shapes=[pltpu.VMEM((c_blk, 1), jnp.float32)],
        compiler_params=pltpu.CompilerParams(
            dimension_semantics=("parallel", "parallel", "arbitrary"),
            vmem_limit_bytes=vmem_limit),
    )(*xs)

    # hoisted attention math: tiny, batched over B, runs on the MXU/VPU via XLA
    S = s_sum[:, :C, 0] * (1.0 / float(HW))                       # (B, C)  avg pool
    Z = S @ jnp.asarray(w1, jnp.float32).T                        # (B, d)  conv_du 1x1
    a = jnp.asarray(prelu_a, jnp.float32)
    Z = jnp.where(Z >= 0, Z, a * Z)                               # PReLU
    A = jnp.einsum('hcd,bd->bhc', jnp.asarray(wfc, jnp.float32), Z)
    att = jax.nn.softmax(A, axis=1)                               # (B, h, C)
    if C_pad != C:
        att = jnp.pad(att, ((0, 0), (0, 0), (0, C_pad - C)))      # tiny
    att = att.reshape(B, height, C_pad, 1)

    # pass 2: apply per-branch attention and fuse (all grid axes parallel)
    compute_dtype = jnp.float32 if bpe >= 4 else dtype
    out = pl.pallas_call(
        partial(_sfi_apply_kernel, height=height, compute_dtype=compute_dtype),
        out_shape=jax.ShapeDtypeStruct((B, C, HW), dtype),
        grid=(B, CB, T),
        in_specs=([pl.BlockSpec((1, c_blk, tile), lambda b, cb, t: (b, cb, t))
                   for _ in range(height)]
                  + [pl.BlockSpec((1, height, c_blk, 1), lambda b, cb, t: (b, 0, cb, 0))]),
        out_specs=pl.BlockSpec((1, c_blk, tile), lambda b, cb, t: (b, cb, t)),
        compiler_params=pltpu.CompilerParams(
            dimension_semantics=("parallel", "parallel", "parallel"),
            vmem_limit_bytes=vmem_limit),
    )(*xs, att)

    return out.reshape(B, C, H, W)


def sfi_reference(inp_feats, w1, prelu_a, wfc):
    """Pure-JAX reference matching the PyTorch forward exactly."""
    x = jnp.stack(inp_feats, axis=1)                 # (B, h, C, H, W)
    U = jnp.sum(x, axis=1)                           # (B, C, H, W)
    S = jnp.mean(U, axis=(2, 3))                     # (B, C)   AdaptiveAvgPool2d(1)
    Z = S @ w1.T                                     # (B, d)   1x1 conv
    Z = jnp.where(Z >= 0, Z, prelu_a * Z)            # PReLU
    A = jnp.einsum('hcd,bd->bhc', wfc, Z)            # (B, h, C)
    A = jax.nn.softmax(A, axis=1)                    # softmax over height
    return jnp.sum(x * A[:, :, :, None, None], axis=1)


if __name__ == "__main__":
    key = jax.random.PRNGKey(0)
    B, C, H, W = 2, 16, 16, 16
    height, reduction = 3, 8
    d = max(int(C / reduction), 4)   # max(int(in_channels/reduction), 4)

    keys = jax.random.split(key, height + 2)
    inp_feats = [jax.random.normal(keys[i], (B, C, H, W), jnp.float32)
                 for i in range(height)]
    w1 = jax.random.normal(keys[height], (d, C), jnp.float32) * 0.1               # conv_du weight
    wfc = jax.random.normal(keys[height + 1], (height, C, d), jnp.float32) * 0.1  # fcs weights
    prelu_a = jnp.float32(0.25)                                                    # PReLU default

    ref = sfi_reference(inp_feats, w1, prelu_a, wfc)

    # fused single-read path (what mode="auto" picks at this size)
    out_fused = jax.block_until_ready(
        sfi_forward(inp_feats, w1, prelu_a, wfc, mode="fused"))
    # two-pass streaming path, forced small tiles to exercise T>1 accumulation and CB>1
    out_2p = jax.block_until_ready(
        sfi_forward(inp_feats, w1, prelu_a, wfc, mode="two_pass",
                    tile_cap=128, c_blk_cap=8))

    assert out_fused.shape == (B, C, H, W)
    assert out_2p.shape == (B, C, H, W)
    assert jnp.allclose(out_fused, ref, atol=1e-5, rtol=1e-5), \
        f"fused max abs diff = {jnp.max(jnp.abs(out_fused - ref))}"
    assert jnp.allclose(out_2p, ref, atol=1e-5, rtol=1e-5), \
        f"two-pass max abs diff = {jnp.max(jnp.abs(out_2p - ref))}"
    print("KERNEL_OK")
</pallas_src>

<mosaic_0001>
module attributes {stable_mosaic.version = 11 : i64} {
  func.func @_sfi_fused_kernel(%arg0: i32, %arg1: memref<1x16x256xf32, #tpu.memory_space<vmem>>, %arg2: memref<1x16x256xf32, #tpu.memory_space<vmem>>, %arg3: memref<1x16x256xf32, #tpu.memory_space<vmem>>, %arg4: memref<4x16xf32, #tpu.memory_space<vmem>>, %arg5: memref<48x4xf32, #tpu.memory_space<vmem>>, %arg6: memref<1x1xf32, #tpu.memory_space<smem>>, %arg7: memref<1x16x256xf32, #tpu.memory_space<vmem>>) attributes {dimension_semantics = [#tpu.dimension_semantics<parallel>], iteration_bounds = array<i64: 2>, scalar_prefetch = 0 : i64, scratch_operands = 0 : i64, tpu.core_type = #tpu.core_type<tc>, window_params = [{transform_indices = @transform_0, window_bounds = array<i64: 1, 16, 256>}, {transform_indices = @transform_1, window_bounds = array<i64: 1, 16, 256>}, {transform_indices = @transform_2, window_bounds = array<i64: 1, 16, 256>}, {pipeline_mode = #tpu.pipeline_mode<synchronous>, transform_indices = @transform_3, window_bounds = array<i64: 4, 16>}, {pipeline_mode = #tpu.pipeline_mode<synchronous>, transform_indices = @transform_4, window_bounds = array<i64: 48, 4>}, {transform_indices = @transform_5, window_bounds = array<i64: 1, 1>}, {transform_indices = @transform_6, window_bounds = array<i64: 1, 16, 256>}]} {
    %c0 = arith.constant 0 : index
    %c0_0 = arith.constant 0 : index
    %c0_1 = arith.constant 0 : index
    %0 = vector.load %arg1[%c0, %c0_0, %c0_1] : memref<1x16x256xf32, #tpu.memory_space<vmem>>, vector<1x16x256xf32>
    %1 = vector.shape_cast %0 : vector<1x16x256xf32> to vector<16x256xf32>
    %c0_2 = arith.constant 0 : index
    %c0_3 = arith.constant 0 : index
    %c0_4 = arith.constant 0 : index
    %2 = vector.load %arg2[%c0_2, %c0_3, %c0_4] : memref<1x16x256xf32, #tpu.memory_space<vmem>>, vector<1x16x256xf32>
    %3 = vector.shape_cast %2 : vector<1x16x256xf32> to vector<16x256xf32>
    %4 = arith.addf %1, %3 : vector<16x256xf32>
    %c0_5 = arith.constant 0 : index
    %c0_6 = arith.constant 0 : index
    %c0_7 = arith.constant 0 : index
    %5 = vector.load %arg3[%c0_5, %c0_6, %c0_7] : memref<1x16x256xf32, #tpu.memory_space<vmem>>, vector<1x16x256xf32>
    %6 = vector.shape_cast %5 : vector<1x16x256xf32> to vector<16x256xf32>
    %7 = arith.addf %4, %6 : vector<16x256xf32>
    %cst = arith.constant dense<0.000000e+00> : vector<16xf32>
    %8 = vector.multi_reduction <add>, %7, %cst [1] : vector<16x256xf32> to vector<16xf32>
    %9 = vector.shape_cast %8 : vector<16xf32> to vector<16x1xf32>
    %cst_8 = arith.constant 3.906250e-03 : f32
    %10 = vector.broadcast %cst_8 : f32 to vector<16x1xf32>
    %11 = arith.mulf %9, %10 : vector<16x1xf32>
    %c0_9 = arith.constant 0 : index
    %c0_10 = arith.constant 0 : index
    %12 = vector.load %arg4[%c0_9, %c0_10] : memref<4x16xf32, #tpu.memory_space<vmem>>, vector<4x16xf32>
    %cst_11 = arith.constant dense<0.000000e+00> : vector<4x1xf32>
    %13 = tpu.matmul %12, %11, %cst_11 {dimension_numbers = #tpu.dot_dimension_numbers<[1], [0], [0], [1], [0, 0, 1, 1], [], []>} : vector<4x16xf32>, vector<16x1xf32>, vector<4x1xf32> -> vector<4x1xf32>
    %c0_12 = arith.constant 0 : index
    %c0_13 = arith.constant 0 : index
    %14 = memref.load %arg6[%c0_12, %c0_13] : memref<1x1xf32, #tpu.memory_space<smem>>
    %cst_14 = arith.constant 0.000000e+00 : f32
    %15 = vector.broadcast %cst_14 : f32 to vector<4x1xf32>
    %16 = arith.cmpf oge, %13, %15 : vector<4x1xf32>
    %17 = vector.broadcast %14 : f32 to vector<4x1xf32>
    %18 = arith.mulf %17, %13 : vector<4x1xf32>
    %19 = arith.select %16, %13, %18 : vector<4x1xi1>, vector<4x1xf32>
    %c0_15 = arith.constant 0 : index
    %c0_16 = arith.constant 0 : index
    %20 = vector.load %arg5[%c0_15, %c0_16] : memref<48x4xf32, #tpu.memory_space<vmem>>, vector<48x4xf32>
    %cst_17 = arith.constant dense<0.000000e+00> : vector<48x1xf32>
    %21 = tpu.matmul %20, %19, %cst_17 {dimension_numbers = #tpu.dot_dimension_numbers<[1], [0], [0], [1], [0, 0, 1, 1], [], []>} : vector<48x4xf32>, vector<4x1xf32>, vector<48x1xf32> -> vector<48x1xf32>
    %22 = vector.extract_strided_slice %21 {offsets = [0, 0], sizes = [16, 1], strides = [1, 1]} : vector<48x1xf32> to vector<16x1xf32>
    %23 = vector.extract_strided_slice %21 {offsets = [16, 0], sizes = [16, 1], strides = [1, 1]} : vector<48x1xf32> to vector<16x1xf32>
    %24 = vector.extract_strided_slice %21 {offsets = [32, 0], sizes = [16, 1], strides = [1, 1]} : vector<48x1xf32> to vector<16x1xf32>
    %25 = arith.maximumf %22, %23 : vector<16x1xf32>
    %26 = arith.maximumf %25, %24 : vector<16x1xf32>
    %27 = arith.subf %22, %26 : vector<16x1xf32>
    %28 = math.exp %27 : vector<16x1xf32>
    %29 = arith.subf %23, %26 : vector<16x1xf32>
    %30 = math.exp %29 : vector<16x1xf32>
    %31 = arith.subf %24, %26 : vector<16x1xf32>
    %32 = math.exp %31 : vector<16x1xf32>
    %33 = arith.addf %28, %30 : vector<16x1xf32>
    %34 = arith.addf %33, %32 : vector<16x1xf32>
    %35 = tpu.reciprocal %34 : vector<16x1xf32> -> vector<16x1xf32>
    %c0_18 = arith.constant 0 : index
    %c0_19 = arith.constant 0 : index
    %c0_20 = arith.constant 0 : index
    %36 = vector.load %arg1[%c0_18, %c0_19, %c0_20] : memref<1x16x256xf32, #tpu.memory_space<vmem>>, vector<1x16x256xf32>
    %37 = vector.shape_cast %36 : vector<1x16x256xf32> to vector<16x256xf32>
    %38 = arith.mulf %28, %35 : vector<16x1xf32>
    %39 = vector.broadcast %38 : vector<16x1xf32> to vector<16x256xf32>
    %40 = arith.mulf %37, %39 : vector<16x256xf32>
    %c0_21 = arith.constant 0 : index
    %c0_22 = arith.constant 0 : index
    %c0_23 = arith.constant 0 : index
    %41 = vector.load %arg2[%c0_21, %c0_22, %c0_23] : memref<1x16x256xf32, #tpu.memory_space<vmem>>, vector<1x16x256xf32>
    %42 = vector.shape_cast %41 : vector<1x16x256xf32> to vector<16x256xf32>
    %43 = arith.mulf %30, %35 : vector<16x1xf32>
    %44 = vector.broadcast %43 : vector<16x1xf32> to vector<16x256xf32>
    %45 = arith.mulf %42, %44 : vector<16x256xf32>
    %46 = arith.addf %40, %45 : vector<16x256xf32>
    %c0_24 = arith.constant 0 : index
    %c0_25 = arith.constant 0 : index
    %c0_26 = arith.constant 0 : index
    %47 = vector.load %arg3[%c0_24, %c0_25, %c0_26] : memref<1x16x256xf32, #tpu.memory_space<vmem>>, vector<1x16x256xf32>
    %48 = vector.shape_cast %47 : vector<1x16x256xf32> to vector<16x256xf32>
    %49 = arith.mulf %32, %35 : vector<16x1xf32>
    %50 = vector.broadcast %49 : vector<16x1xf32> to vector<16x256xf32>
    %51 = arith.mulf %48, %50 : vector<16x256xf32>
    %52 = arith.addf %46, %51 : vector<16x256xf32>
    %c0_27 = arith.constant 0 : index
    %c0_28 = arith.constant 0 : index
    %c0_29 = arith.constant 0 : index
    %53 = vector.load %arg7[%c0_27, %c0_28, %c0_29] : memref<1x16x256xf32, #tpu.memory_space<vmem>>, vector<1x16x256xf32>
    %54 = vector.shape_cast %53 : vector<1x16x256xf32> to vector<16x256xf32>
    %55 = vector.shape_cast %52 : vector<16x256xf32> to vector<1x16x256xf32>
    tpu.vector_store %arg7[%c0_27, %c0_28, %c0_29], %55 {strides = array<i32>} : memref<1x16x256xf32, #tpu.memory_space<vmem>>, vector<1x16x256xf32>,
    return
  }
  func.func @transform_0(%arg0: i32) -> (i32, i32, i32) {
    %c0_i32 = arith.constant 0 : i32
    %c0_i32_0 = arith.constant 0 : i32
    %c0_i32_1 = arith.constant 0 : i32
    return %arg0, %c0_i32, %c0_i32_0 : i32, i32, i32
  }
  func.func @transform_1(%arg0: i32) -> (i32, i32, i32) {
    %c0_i32 = arith.constant 0 : i32
    %c0_i32_0 = arith.constant 0 : i32
    %c0_i32_1 = arith.constant 0 : i32
    return %arg0, %c0_i32, %c0_i32_0 : i32, i32, i32
  }
  func.func @transform_2(%arg0: i32) -> (i32, i32, i32) {
    %c0_i32 = arith.constant 0 : i32
    %c0_i32_0 = arith.constant 0 : i32
    %c0_i32_1 = arith.constant 0 : i32
    return %arg0, %c0_i32, %c0_i32_0 : i32, i32, i32
  }
  func.func @transform_3(%arg0: i32) -> (i32, i32) {
    %c0_i32 = arith.constant 0 : i32
    %c0_i32_0 = arith.constant 0 : i32
    %c0_i32_1 = arith.constant 0 : i32
    return %c0_i32, %c0_i32_0 : i32, i32
  }
  func.func @transform_4(%arg0: i32) -> (i32, i32) {
    %c0_i32 = arith.constant 0 : i32
    %c0_i32_0 = arith.constant 0 : i32
    %c0_i32_1 = arith.constant 0 : i32
    return %c0_i32, %c0_i32_0 : i32, i32
  }
  func.func @transform_5(%arg0: i32) -> (i32, i32) {
    %c0_i32 = arith.constant 0 : i32
    %c0_i32_0 = arith.constant 0 : i32
    %c0_i32_1 = arith.constant 0 : i32
    return %c0_i32, %c0_i32_0 : i32, i32
  }
  func.func @transform_6(%arg0: i32) -> (i32, i32, i32) {
    %c0_i32 = arith.constant 0 : i32
    %c0_i32_0 = arith.constant 0 : i32
    %c0_i32_1 = arith.constant 0 : i32
    return %arg0, %c0_i32, %c0_i32_0 : i32, i32, i32
  }
}

</mosaic_0001>

<bundles_post_ra>
// kernel: tpu_custom_call.1
= control target key start
LH: loop header
LB: loop body
LE: loop exit
PB: predicated region body
PF: predicated region fallthrough
CT: control target
= control target key end

     0   :  { %s1467_s0 = inlined_call_operand.hbm [shape: f32[2,16,256], index: 0, kind: input, shape index: {}]   ;;  %s1468_s1 = inlined_call_operand.hbm [shape: f32[2,16,256], index: 1, kind: input, shape index: {}]   ;;  %s1469_s2 = inlined_call_operand.hbm [shape: f32[2,16,256], index: 2, kind: input, shape index: {}]   ;;  %s1470_s3 = inlined_call_operand.vmem [shape: f32[4,16], index: 3, kind: input, shape index: {}]   ;;  %s1471_s4 = inlined_call_operand.vmem [shape: f32[48,4], index: 4, kind: input, shape index: {}]   ;;  %s1472_s5 = inlined_call_operand.<no memory space> [shape: f32[1,1], index: 5, kind: input, shape index: {}]   ;;  %s1473_s6 = inlined_call_operand.hbm [shape: f32[2,16,256], index: 6, kind: output, shape index: {}]  }
   0x1   :  { %1482 = sst [smem:[#allocation15_spill]] %s1467_s0 }
   0x2   :  { %1483 = sst [smem:[#allocation16_spill]] %s1468_s1 }
   0x3   :  { %11 = sst [smem:[#allocation2]] %s1472_s5 }
   0x4   :  { %12 = vsyncpa [#allocation4], 0 }
   0x5   :  { %14 = vsyncpa [#allocation4 + $0x1], 0 }
   0x6   :  { %15 = vsyncpa [#allocation7], 0 }
   0x7   :  { %17 = vsyncpa [#allocation7 + $0x1], 0 }
   0x8   :  { %18 = vsyncpa [#allocation5], 0 }
   0x9   :  { %20 = vsyncpa [#allocation5 + $0x1], 0  ;;  %s1144_s23 = smov 0   ;;  %s1146_s24 = smov 0  }
   0xa   :  { %s1148_s25 = smov 0   ;;  %s1150_s26 = smov 0  }
   0xb LB: > { %1484 = sst [smem:[#allocation13_spill]] %s1089_s25  ;;  %s1165_s5 = sadd.s32 4294967295, %s1093_s26   ;;  %s1093_s26 = sphi %s1150_s26, %s1507_s26   ;;  %s1089_s25 = sphi %s1148_s25, %s1504_s25   ;;  %s1085_s24 = sphi %s1146_s24, %s1506_s24   ;;  %s1081_s23 = sphi %s1144_s23, %s1505_s23  }
   0xc   : > { %s798_s27 = sadd.s32 4294967294, %s1093_s26   ;;  %s1169_s28 = sadd.s32 1, %s1093_s26  }
   0xd   : > { %s33_s29 = sadd.s32 1, %s1089_s25  ;;  %s30_s30 = ssub.s32 %s1093_s26, %s1169_s28 }
   0xe   : > { %p40_p0 = scmp.ne.s32.totalorder %s1089_s25, %s1085_s24  ;;  %p31_p1 = scmp.eq.s32.totalorder %s30_s30, 0 }
   0xf   : > { %p41_p2 = scmp.eq.s32.totalorder %s1093_s26, 0  ;;  %p46_p3 = scmp.ne.s32.totalorder %s1085_s24, %s1081_s23 }
  0x10   : > { %p47_p4 = scmp.eq.s32.totalorder %s1165_s5, 0  ;;  %p185_p7 = scmp.eq.s32.totalorder %s1165_s5, 1 }
  0x11   : > { %s1181_s7 = scalar_select %p31_p1, %s1089_s25, %s33_s29  }
  0x12   : > { %p42_p5 = por %p41_p2, %p40_p0  ;;  %p1183_p6 = por %p47_p4, %p46_p3 }
  0x13   : > { %1485 = sst [smem:[#allocation14_spill]] %s1181_s7  ;;  %p191_p8 = scmp.eq.s32.totalorder %s798_s27, 1 }
  0x14   : > { %s1486_s8 = scalar_select %p1183_p6, 1, 0 }
  0x15   : > { %p882_p10 = scmp.lt.s32.totalorder %s1093_s26, 2  ;;  %p1190_p11 = por %p185_p7, %p40_p0 }
  0x16   : > { %p1194_p12 = por %p191_p8, %p46_p3  ;;  %s1474_s11 = sand.u32 1, %s1089_s25  }
  0x17   : > { %s1487_s9 = scalar_select %p1190_p11, 1, 0 }
  0x18   : > { %s1488_s10 = scalar_select %p1194_p12, 1, 0 }
  0x19   : > { %s1200_s12 = sshll.u32 %s1093_s26, 9  ;;  %s1204_s13 = sshll.u32 %s1474_s11, 5 }
  0x1a   : > { %p1206_p13 = pnand %p882_p10, %p42_p5  ;;  %s241_s15 = sand.u32 1, %s1093_s26  }
  0x1b   : > { %s1490_s1 = sld [smem:[#allocation16_spill]]  ;;  %s245_s19 = scalar_lea.vmem [#allocation6], %s1204_s13 }
  0x1c   : > { %s252_s20 = sshll.u32 %s245_s19, 4  ;;  %s1221_s21 = scalar_lea.sflag [#allocation7], %s241_s15  ;;  %s1218_s20 = int_to_ptr.vmem [resolvable:$true] %s252_s20 }
  0x1d   : > { %p1227_p2 = pneg %p1206_p13 }
  0x21   : > { %s1215_s18 = scalar_lea.hbm %s1490_s1, %s1200_s12  ;;  %s946_s16 = scalar_lea.hbm %s1490_s1, 1024 }
  0x22   : > { %s941_s22 = scalar_lea.hbm %s1215_s18, 512  ;;  %p947_p5 = scmp.lt.s32.totalorder %s1215_s18, %s1490_s1 }
  0x23   : > { %p942_p1 = scmp.ne.s32.totalorder %s1215_s18, %s941_s22  ;;  %p948_p7 = scmp.lt.s32.totalorder %s946_s16, %s941_s22 }
  0x25   : > { %p944_p3 = pnand %p1227_p2, %p942_p1  ;;  %p949_p8 = por %p948_p7, %p947_p5 }
  0x27   : > { %p945_p4 = pneg %p944_p3 }
  0x29   : > { %p950_p10 = pnand %p949_p8, %p945_p4 }
  0x2b   : > { %953 = shalt.err (!%p950_p10)
}
  0x2c   : > { %s954_s15 = scalar_lea.vmem %s1218_s20, 512  ;;  %s1095_s11 = smov [#allocation6]  }
  0x2d   : > { %p955_p9 = scmp.ne.s32.totalorder %s1218_s20, %s954_s15  ;;  %s959_s29 = sshll.u32 %s1095_s11, 4  ;;  %s960_s29 = int_to_ptr.vmem [resolvable:$false] %s959_s29 }
  0x2e   : > { %s961_s30 = scalar_lea.vmem %s960_s29, 1024  ;;  %p962_p0 = scmp.lt.s32.totalorder %s1218_s20, %s960_s29 }
  0x2f   : > { %p957_p1 = pnand %p955_p9, %p1227_p2  ;;  %p963_p12 = scmp.lt.s32.totalorder %s961_s30, %s954_s15 }
  0x31   : > { %p958_p3 = pneg %p957_p1  ;;  %p964_p11 = por %p963_p12, %p962_p0 }
  0x33   : > { %p965_p6 = pnand %p964_p11, %p958_p3 }
  0x35   : > { %968 = shalt.err (!%p965_p6)
}
  0x36   : > { %s1477_s22 = smov 256   ;;  %s1479_s16 = smov 16  }
  0x37   : > { %874 = dma.hbm_to_vmem [thread:$0]  (!%p1206_p13), %s1215_s18, 512, %s1218_s20, %s1221_s21, %s1477_s22, %s1477_s22, %s1479_s16  }
  0x38   : > { %p281_p9 = scmp.lt.s32.totalorder %s1093_s26, 3  ;;  %s1492_s0 = sld [smem:[#allocation15_spill]] }
  0x39   : > { %p1493_p6 = scmp.ge.s32.totalorder %s1093_s26, 1  ;;  %s224_s29 = scalar_lea.vmem [#allocation3], %s1204_s13 }
  0x3a   : > { %s231_s30 = sshll.u32 %s224_s29, 4  ;;  %s1495_s1 = sand.u32 1, %s1089_s25   ;;  %s1267_s30 = int_to_ptr.vmem [resolvable:$true] %s231_s30 }
  0x3b   : > { %p1262_p11 = pnand %p1493_p6, %p281_p9  ;;  %s221_s18 = scalar_lea.sflag [#allocation4], %s1495_s1 }
  0x3d   : > { %s1494_s15 = scalar_select %p1262_p11, 1, 0 }
  0x3e   : > { %s1258_s19 = scalar_lea.hbm %s1492_s0, %s1200_s12  ;;  %s974_s22 = scalar_lea.hbm %s1492_s0, 1024 }
  0x3f   : > { %s969_s20 = scalar_lea.hbm %s1258_s19, 512  ;;  %p975_p5 = scmp.lt.s32.totalorder %s1258_s19, %s1492_s0 }
  0x40   : > { %p970_p12 = scmp.ne.s32.totalorder %s1258_s19, %s969_s20  ;;  %p976_p7 = scmp.lt.s32.totalorder %s974_s22, %s969_s20 }
  0x42   : > { %p972_p0 = pnand %p970_p12, %p1227_p2  ;;  %p977_p8 = por %p976_p7, %p975_p5 }
  0x44   : > { %p973_p4 = pneg %p972_p0 }
  0x46   : > { %p978_p10 = pnand %p977_p8, %p973_p4 }
  0x48   : > { %981 = shalt.err (!%p978_p10)
}
  0x49   : > { %s982_s1 = scalar_lea.vmem %s1267_s30, 512  ;;  %s1098_s29 = smov [#allocation3]  }
  0x4a   : > { %p983_p1 = scmp.ne.s32.totalorder %s1267_s30, %s982_s1  ;;  %s987_s11 = sshll.u32 %s1098_s29, 4  ;;  %s988_s11 = int_to_ptr.vmem [resolvable:$false] %s987_s11 }
  0x4b   : > { %s989_s17 = scalar_lea.vmem %s988_s11, 1024  ;;  %p990_p6 = scmp.lt.s32.totalorder %s1267_s30, %s988_s11 }
  0x4c   : > { %p985_p3 = pnand %p983_p1, %p1227_p2  ;;  %p991_p12 = scmp.lt.s32.totalorder %s989_s17, %s982_s1 }
  0x4e   : > { %p986_p9 = pneg %p985_p3  ;;  %p992_p0 = por %p991_p12, %p990_p6 }
  0x50   : > { %p993_p11 = pnand %p992_p0, %p986_p9 }
  0x52   : > { %996 = shalt.err (!%p993_p11)
}
  0x53   : > { %s1496_s7 = smov 16   ;;  %s1497_s22 = smov 256  }
  0x54   : > { %871 = dma.hbm_to_vmem [thread:$0]  (!%p1206_p13), %s1258_s19, 512, %s1267_s30, %s221_s18, %s1497_s22, %s1497_s22, %s1496_s7  }
  0x55   : > { %s1298_s29 = scalar_lea.hbm %s1469_s2, %s1200_s12  ;;  %s266_s1 = scalar_lea.vmem [#allocation8], %s1204_s13 }
  0x56   : > { %s273_s11 = sshll.u32 %s266_s1, 4  ;;  %s997_s17 = scalar_lea.hbm %s1298_s29, 512  ;;  %s274_s11 = int_to_ptr.vmem [resolvable:$true] %s273_s11 }
  0x57   : > { %p998_p11 = scmp.ne.s32.totalorder %s1298_s29, %s997_s17  ;;  %s1002_s19 = scalar_lea.hbm %s1469_s2, 1024 }
  0x58   : > { %p1003_p7 = scmp.lt.s32.totalorder %s1298_s29, %s1469_s2  ;;  %p1004_p8 = scmp.lt.s32.totalorder %s1002_s19, %s997_s17 }
  0x59   : > { %p1000_p4 = pnand %p998_p11, %p1227_p2 }
  0x5a   : > { %p1005_p10 = por %p1004_p8, %p1003_p7 }
  0x5b   : > { %p1001_p5 = pneg %p1000_p4 }
  0x5d   : > { %p1006_p1 = pnand %p1005_p10, %p1001_p5 }
  0x5f   : > { %1009 = shalt.err (!%p1006_p1)
}
  0x60   : > { %s1010_s12 = scalar_lea.vmem %s274_s11, 512  ;;  %s1099_s13 = smov [#allocation8]  }
  0x61   : > { %p1011_p3 = scmp.ne.s32.totalorder %s274_s11, %s1010_s12  ;;  %s1015_s16 = sshll.u32 %s1099_s13, 4  ;;  %s1016_s16 = int_to_ptr.vmem [resolvable:$false] %s1015_s16 }
  0x62   : > { %s1017_s20 = scalar_lea.vmem %s1016_s16, 1024  ;;  %p1018_p12 = scmp.lt.s32.totalorder %s274_s11, %s1016_s16 }
  0x63   : > { %p1013_p9 = pnand %p1011_p3, %p1227_p2  ;;  %p1019_p0 = scmp.lt.s32.totalorder %s1017_s20, %s1010_s12 }
  0x65   : > { %p1014_p6 = pneg %p1013_p9  ;;  %p1020_p11 = por %p1019_p0, %p1018_p12 }
  0x67   : > { %p1021_p4 = pnand %p1020_p11, %p1014_p6 }
  0x69   : > { %1024 = shalt.err (!%p1021_p4)
}
  0x6a   : > { %877 = dma.hbm_to_vmem [thread:$0]  (!%p1206_p13), %s1298_s29, 512, %s274_s11, %s1221_s21, %s1497_s22, %s1497_s22, %s1496_s7  }
  0x6b   : > { %p1498_p2 = scmp.ne.s32.totalorder %s1494_s15, 0 }
  0x6c   : > { %s1324_s0 = sand.u32 (!%p1498_p2), 1, %s1085_s24   ;;  %p1499_p5 = scmp.ne.s32.totalorder (!%p1498_p2), %s1486_s8, 0 }
  0x6d   : > { %285 = sbr.rel (%p1498_p2) target bundleno = 869 (0x365), region = 44  ;;  %s1327_s25 = sshll.u32 (!%p1498_p2), %s1324_s0, 5 }
  0x6e   : > { %s288_s27 = scalar_lea.sflag (!%p1498_p2), [#allocation4], %s1324_s0  ;;  %s291_s14 = scalar_lea.vmem (!%p1498_p2), [#allocation3], %s1327_s25 }
  0x72   : > { %1068 = dma.done.wait (%p1499_p5), %s288_s27, 512  }
  0x73   : > { %1070 = vsyncadd (%p1499_p5), %s288_s27, 4294966784  ;;  %s296_s21 = sand.u32 1, %s1165_s5   ;;  %s300_s7 = scalar_lea.vmem [#allocation6], %s1327_s25 }
  0x74   : > { %s297_s15 = scalar_lea.sflag [#allocation7], %s296_s21 }
  0x75   : > { %1072 = dma.done.wait (%p1499_p5), %s297_s15, 1024  }
  0x76   : > { %1074 = vsyncadd (%p1499_p5), %s297_s15, 4294966272  ;;  %v1341_v0 = vld [vmem:[%s291_s14 + $0x10] sm:$0xff]  ;;  %v1343_v1 = vld [vmem:[%s291_s14 + $0x18] sm:$0xff]  ;;  %s309_s22 = scalar_lea.vmem [#allocation8], %s1327_s25  ;;  %v1100_v22 = vmov 0.0   ;;  %vm1101_vm0 = vmmov 0  }
  0x77   : > { %v1345_v2 = vld [vmem:[%s300_s7 + $0x10] sm:$0xff]  ;;  %v1347_v3 = vld [vmem:[%s300_s7 + $0x18] sm:$0xff]  ;;  %v1358_v8 = vld [vmem:[%s291_s14] sm:$0xff]  ;;  %842 = vmatprep.subr.mxu0 %v1100_v22  ;;  %846 = vmatprep.mubr.msk.f32.mxu0 %vm1101_vm0, %v1100_v22  ;;  %vm377_vm1 = vcmask 130048   ;;  %vm462_vm2 = vcmask 31744   ;;  %s451_s17 = sld [smem:[#allocation2]] }
  0x78   : > { %v358_v4 = vadd.f32 %v1345_v2, %v1341_v0  ;;  %v1352_v5 = vld [vmem:[%s309_s22 + $0x10] sm:$0xff]  ;;  %v1354_v6 = vld [vmem:[%s309_s22 + $0x18] sm:$0xff]  ;;  %v359_v7 = vadd.f32 %v1347_v3, %v1343_v1  ;;  %v1360_v9 = vld [vmem:[%s291_s14 + $0x8] sm:$0xff]  ;;  %vm481_vm4 = vcmask 1043456   ;;  %v1102_v39 = vmov 0   ;;  %s347_s15 = scalar_lea.vmem [#allocation9], %s1327_s25 }
  0x79   : > { %v1362_v10 = vld [vmem:[%s300_s7] sm:$0xff]  ;;  %v1365_v12 = vld [vmem:[%s300_s7 + $0x8] sm:$0xff]  ;;  %v458_v35 = vld [vmem:[%s1471_s4 + $0x10] sm:$0xff]  ;;  %923 = vset.pattern.permute.xlu1 %v1102_v39  ;;  %924 = vset.pattern.permute.xlu0 %v1102_v39  ;;  %s682_s7 = sshll.u32 %s347_s15, 4  ;;  %p1500_p7 = scmp.ne.s32.totalorder %s1487_s9, 0  ;;  %s1417_s7 = int_to_ptr.vmem [resolvable:$true] %s682_s7 }
  0x7a   : > { %v366_v11 = vadd.f32 %v1352_v5, %v358_v4  ;;  %v356_v13 = vadd.f32 %v1362_v10, %v1358_v8  ;;  %v1369_v14 = vld [vmem:[%s309_s22] sm:$0xff]  ;;  %v1371_v15 = vld [vmem:[%s309_s22 + $0x8] sm:$0xff]  ;;  %v367_v16 = vadd.f32 %v1354_v6, %v359_v7  ;;  %v357_v17 = vadd.f32 %v1365_v12, %v1360_v9  ;;  %v459_v36 = vld [vmem:[%s1471_s4 + $0x18] sm:$0xff]  ;;  %s831_s22 = sshll.u32 %s1165_s5, 9  ;;  %s669_s5 = scalar_lea.sflag [#allocation5], %s1324_s0 }
  0x7b   : > { %v376_v27 = vld [vmem:[%s1470_s3] sm:$0xf]  ;;  %v457_v34 = vld [vmem:[%s1471_s4 + $0x8] sm:$0xff]  ;;  %s1424_s29 = scalar_lea.hbm %s1473_s6, %s831_s22  ;;  %s1025_s1 = scalar_lea.vmem %s1417_s7, 512 }
  0x7c   : > { %v364_v18 = vadd.f32 %v1369_v14, %v356_v13  ;;  %v371_v19 = vadd.f32 %v367_v16, %v366_v11  ;;  %v365_v20 = vadd.f32 %v1371_v15, %v357_v17  ;;  %v456_v28 = vld [vmem:[%s1471_s4] sm:$0xff]  ;;  %v461_v38 = vld [vmem:[%s1471_s4 + $0x28] sm:$0xff]  ;;  %p1026_p13 = scmp.ne.s32.totalorder %s1417_s7, %s1025_s1  ;;  %s1103_s11 = smov [#allocation9]  }
  0x7d   : > { %851 = vmatprep.mubr.msk.f32.mxu1 %vm462_vm2, %v456_v28  ;;  %v453_v29 = vstv %s451_s17  ;;  %v460_v37 = vld [vmem:[%s1471_s4 + $0x20] sm:$0xff]  ;;  %s1029_s17 = sshll.u32 %s1103_s11, 4  ;;  %s1030_s17 = int_to_ptr.vmem [resolvable:$false] %s1029_s17 }
  0x7e   : > { %372 = vadd.xlane.f32.xlu0 %v371_v19  ;;  %v368_v21 = vadd.f32 %v365_v20, %v364_v18  ;;  %p1027_p8 = pnand %p1026_p13, %p1500_p7  ;;  %s1031_s19 = scalar_lea.vmem %s1030_s17, 1024 }
  0x7f   : > { %p1032_p1 = scmp.lt.s32.totalorder %s1417_s7, %s1030_s17  ;;  %p1033_p3 = scmp.lt.s32.totalorder %s1031_s19, %s1025_s1 }
  0x80   : > { %p1028_p10 = pneg %p1027_p8 }
  0x81   : > { %p1034_p9 = por %p1033_p3, %p1032_p1 }
  0x82   : > { %369 = vadd.xlane.f32.xlu0 %v368_v21 }
  0x83   : > { %p1035_p6 = pnand %p1034_p9, %p1028_p10 }
 0x107   : > { %v373_v23 = vpop.xlane.xlu0 %372 }
 0x108   : > { %v375_v24 = vmul.f32 0.00390625, %v373_v23 }
 0x10a   : > { %843 = vmatpush3.msra.mxu0 %v375_v24 }
 0x10b   : > { %v370_v25 = vpop.xlane.xlu0 %369  ;;  %844 = vmatprep.subr.mxu0 %v1100_v22 }
 0x10c   : > { %v374_v26 = vmul.f32 0.00390625, %v370_v25 }
 0x10e   : > { %845 = vmatpush3.msra.mxu0 %v374_v26 }
 0x10f   : > { %847 = vmatmul.mubr.msk.f32.vlgmr.msra.gmra.mxu0 %vm377_vm1, %v376_v27 }
 0x1cf   : > { %v447_v30 = vpop.f32.mrf.mxu0 }
 0x1d0   : > { %v454_v31 = vmul.f32 %v453_v29, %v447_v30  ;;  %vm452_vm3 = vcmp.ge.f32.partialorder %v447_v30, 0.0 }
 0x1d1   : > { %v848_v32 = vpop.f32.mrf.mxu0 }
 0x1d2   : > { %v455_v33 = vsel %vm452_vm3, %v447_v30, %v454_v31 }
 0x1d3   : > { %849 = vmatprep.subr.msk.mxu1 %vm481_vm4, %v455_v33 }
 0x1d4   : > { %850 = vmatpush3.msk.msra.mxu1 %vm481_vm4, %v455_v33 }
 0x1d5   : > { %852 = vmatmul.mubr.msk.f32.vlgmr.msra.gmra.mxu1 %vm462_vm2, %v457_v34 }
 0x1d6   : > { %854 = vmatprep.mubr.msk.f32.mxu1 %vm462_vm2, %v458_v35 }
 0x1d9   : > { %855 = vmatmul.mubr.msk.f32.gmra.mxu1 %vm462_vm2, %v459_v36 }
 0x1da   : > { %857 = vmatprep.mubr.msk.f32.mxu1 %vm462_vm2, %v460_v37 }
 0x1dd   : > { %858 = vmatmul.mubr.msk.f32.gmra.mxu1 %vm462_vm2, %v461_v38 }
 0x295   : > { %v853_v40 = vpop.f32.mrf.mxu1 }
 0x297   : > { %v551_v41 = vpop.f32.mrf.mxu1 }
 0x299   : > { %v856_v42 = vpop.f32.mrf.mxu1 }
 0x29a   : > { %v581_v44 = vmax.f32 %v853_v40, %v856_v42 }
 0x29b   : > { %v561_v43 = vpop.f32.mrf.mxu1 }
 0x29c   : > { %v580_v46 = vmax.f32 %v551_v41, %v561_v43 }
 0x29d   : > { %v859_v45 = vpop.f32.mrf.mxu1 }
 0x29e   : > { %v583_v47 = vmax.f32 %v581_v44, %v859_v45 }
 0x29f   : > { %v571_v48 = vpop.f32.mrf.mxu1 }
 0x2a0   : > { %v585_v49 = vsub.f32 %v853_v40, %v583_v47  ;;  %v591_v50 = vsub.f32 %v856_v42, %v583_v47  ;;  %v597_v51 = vsub.f32 %v859_v45, %v583_v47  ;;  %v582_v52 = vmax.f32 %v580_v46, %v571_v48 }
 0x2a2   : > { %v588_v53 = vmul.f32 1.442695, %v585_v49  ;;  %v594_v54 = vmul.f32 1.442695, %v591_v50  ;;  %v600_v55 = vmul.f32 1.442695, %v597_v51  ;;  %v584_v56 = vsub.f32 %v551_v41, %v582_v52 }
 0x2a3   : > { %v590_v57 = vsub.f32 %v561_v43, %v582_v52  ;;  %v596_v58 = vsub.f32 %v571_v48, %v582_v52 }
 0x2a4   : > { %925 = vpow2.f32 %v588_v53  ;;  %v586_v59 = vmul.f32 1.442695, %v584_v56 }
 0x2a5   : > { %927 = vpow2.f32 %v594_v54  ;;  %v592_v60 = vmul.f32 1.442695, %v590_v57  ;;  %v598_v61 = vmul.f32 1.442695, %v596_v58 }
 0x2a6   : > { %929 = vpow2.f32 %v600_v55 }
 0x2a7   : > { %931 = vpow2.f32 %v586_v59 }
 0x2a8   : > { %933 = vpow2.f32 %v592_v60 }
 0x2a9   : > { %935 = vpow2.f32 %v598_v61 }
 0x2b1   : > { %v926_v62 = vpop.eup %925 }
 0x2b2   : > { %v928_v63 = vpop.eup %927 }
 0x2b3   : > { %v930_v4 = vpop.eup %929  ;;  %v603_v7 = vadd.f32 %v928_v63, %v926_v62 }
 0x2b4   : > { %v932_v11 = vpop.eup %931 }
 0x2b5   : > { %v934_v13 = vpop.eup %933  ;;  %v605_v16 = vadd.f32 %v930_v4, %v603_v7 }
 0x2b6   : > { %v602_v17 = vadd.f32 %v934_v13, %v932_v11  ;;  %v936_v18 = vpop.eup %935 }
 0x2b7   : > { %937 = vrcp.f32 %v605_v16 }
 0x2b8   : > { %v604_v19 = vadd.f32 %v936_v18, %v602_v17 }
 0x2ba   : > { %939 = vrcp.f32 %v604_v19 }
 0x2c4   : > { %v938_v20 = vpop.eup %937 }
 0x2c5   : > { %v609_v21 = vmul.f32 %v938_v20, %v926_v62  ;;  %v625_v25 = vmul.f32 %v938_v20, %v928_v63  ;;  %v645_v27 = vmul.f32 %v938_v20, %v930_v4 }
 0x2c7   : > { %v940_v22 = vpop.eup %939  ;;  %617 = vperm.xlu1 %923, %v609_v21  }
 0x2c8   : > { %v624_v23 = vmul.f32 %v940_v22, %v934_v13  ;;  %v608_v24 = vmul.f32 %v940_v22, %v932_v11  ;;  %v644_v26 = vmul.f32 %v940_v22, %v936_v18 }
 0x2ca   : > { %628 = vperm.xlu0 %924, %v624_v23  }
 0x2cb   : > { %612 = vperm.xlu1 %923, %v608_v24  }
 0x2cf   : > { %633 = vperm.xlu1 %923, %v625_v25  }
 0x2d3   : > { %648 = vperm.xlu1 %923, %v644_v26  }
 0x2d7   : > { %653 = vperm.xlu1 %923, %v645_v27  }
 0x342   : > { %v618_v28 = vpop.permute.xlu1 %617 }
 0x345   : > { %v629_v30 = vpop.permute.xlu0 %628 }
 0x346   : > { %v613_v29 = vpop.permute.xlu1 %612  ;;  %v636_v34 = vmul.f32 %v629_v30, %v1362_v10  ;;  %v637_v35 = vmul.f32 %v629_v30, %v1365_v12 }
 0x347   : > { %v620_v31 = vmul.f32 %v613_v29, %v1358_v8  ;;  %v621_v32 = vmul.f32 %v613_v29, %v1360_v9  ;;  %v622_v8 = vmul.f32 %v618_v28, %v1341_v0  ;;  %v623_v9 = vmul.f32 %v618_v28, %v1343_v1 }
 0x349   : > { %v640_v36 = vadd.f32 %v636_v34, %v620_v31  ;;  %v641_v37 = vadd.f32 %v637_v35, %v621_v32 }
 0x34a   : > { %v634_v33 = vpop.permute.xlu1 %633 }
 0x34b   : > { %v638_v39 = vmul.f32 %v634_v33, %v1345_v2  ;;  %v639_v40 = vmul.f32 %v634_v33, %v1347_v3 }
 0x34d   : > { %v642_v44 = vadd.f32 %v638_v39, %v622_v8  ;;  %v643_v2 = vadd.f32 %v639_v40, %v623_v9 }
 0x34e   : > { %v649_v38 = vpop.permute.xlu1 %648 }
 0x34f   : > { %v656_v41 = vmul.f32 %v649_v38, %v1369_v14  ;;  %v657_v42 = vmul.f32 %v649_v38, %v1371_v15 }
 0x351   : > { %v660_v10 = vadd.f32 %v656_v41, %v640_v36  ;;  %v661_v12 = vadd.f32 %v657_v42, %v641_v37 }
 0x352   : > { %v654_v43 = vpop.permute.xlu1 %653 }
 0x353   : > { %664 = vst [vmem:[%s347_s15] sm:$0xff] %v660_v10  ;;  %665 = vst [vmem:[%s347_s15 + $0x8] sm:$0xff] %v661_v12  ;;  %v658_v3 = vmul.f32 %v654_v43, %v1352_v5  ;;  %v659_v0 = vmul.f32 %v654_v43, %v1354_v6 }
 0x355   : > { %v662_v1 = vadd.f32 %v658_v3, %v642_v44  ;;  %v663_v14 = vadd.f32 %v659_v0, %v643_v2 }
 0x357   : > { %666 = vst [vmem:[%s347_s15 + $0x10] sm:$0xff] %v662_v1  ;;  %667 = vst [vmem:[%s347_s15 + $0x18] sm:$0xff] %v663_v14 }
 0x358   : > { %1038 = shalt.err (!%p1035_p6)
}
 0x359   : > { %s1039_s30 = scalar_lea.hbm %s1424_s29, 512  ;;  %s1043_s13 = scalar_lea.hbm %s1473_s6, 1024 }
 0x35a   : > { %p1040_p12 = scmp.ne.s32.totalorder %s1424_s29, %s1039_s30  ;;  %p1044_p4 = scmp.lt.s32.totalorder %s1424_s29, %s1473_s6 }
 0x35b   : > { %p1045_p2 = scmp.lt.s32.totalorder %s1043_s13, %s1039_s30 }
 0x35c   : > { %p1041_p0 = pnand %p1040_p12, %p1500_p7 }
 0x35d   : > { %p1046_p5 = por %p1045_p2, %p1044_p4 }
 0x35e   : > { %p1042_p11 = pneg %p1041_p0 }
 0x360   : > { %p1047_p13 = pnand %p1046_p5, %p1042_p11 }
 0x362   : > { %1050 = shalt.err (!%p1047_p13)
}
 0x363   : > { %s1104_s27 = smov 256   ;;  %s1105_s14 = smov 16  }
 0x364   : > { %866 = dma.vmem_to_hbm [thread:$0]  (%p1500_p7), %s1417_s7, 512, %s1424_s29, %s669_s5, %s1104_s27, %s1104_s27, %s1105_s14  }
 0x365 PF: > { %s697_s21 = sand.u32 1, %s1081_s23   ;;  %p1501_p8 = scmp.ne.s32.totalorder %s1488_s10, 0 }
 0x366   : > { %p1502_p10 = scmp.ge.s32.totalorder %s1093_s26, 2  ;;  %s698_s15 = scalar_lea.sflag [#allocation5], %s697_s21 }
 0x368   : > { %p879_p1 = pnand %p1502_p10, %p1501_p8 }
 0x36a   : > { %p880_p3 = pneg %p879_p1 }
 0x36c   : > { %1076 = dma.done.wait (%p880_p3), %s698_s15, 512  }
 0x36d   : > { %1078 = vsyncadd (%p880_p3), %s698_s15, 4294966784  ;;  %s1503_s22 = sld [smem:[#allocation13_spill]]  ;;  %p23_p9 = scmp.ge.s32.totalorder %s1169_s28, 4  }
 0x36e   : > { %s1504_s25 = sld [smem:[#allocation14_spill]]  ;;  %s1505_s23 = smov %s1085_s24 }
 0x36f   : > { %s1507_s26 = smov %s1169_s28  ;;  %25 = sbr.rel (!%p23_p9) target bundleno = 11 (0xb), region = 113 }
 0x373   : > { %s1506_s24 = smov %s1503_s22 }
 0x374   :  { %703 = vsyncpa [#allocation4], 1 }
 0x375   :  { %705 = vsyncpa [#allocation4 + $0x1], 1 }
 0x376   :  { %706 = vsyncpa [#allocation7], 1 }
 0x377   :  { %708 = vsyncpa [#allocation7 + $0x1], 1 }
 0x378   :  { %709 = vsyncpa [#allocation5], 1 }
 0x379   :  { %711 = vsyncpa [#allocation5 + $0x1], 1 }

</bundles_post_ra>
